<compile_context>
chip_gen: v5e
topology: v5e:2x2
jax: 0.10.0
libtpu: 0.0.40
codegen_flags: <defaults>
</compile_context>

<pallas_src>
import functools

import jax
import jax.numpy as jnp
from jax import lax
from jax.experimental import pallas as pl
from jax.experimental.pallas import tpu as pltpu


_VMEM_BUDGET = 16 * 1024 * 1024     # double-buffered working-set budget (safe on v5e..v7x)
_VMEM_LIMIT = 32 * 1024 * 1024      # explicit scoped-VMEM limit handed to Mosaic


# ---------------------------------------------------------------------------
# Static tile-size helpers (trace-time only).
# ---------------------------------------------------------------------------
def _divisors_desc(n):
    return [d for d in range(n, 0, -1) if n % d == 0]


def _pick_conv_tile(h_out, w_out, c8, cout, out_bytes, batch, tile_h):
    """Largest output-row tile th (dividing h_out) whose double-buffered set fits VMEM."""
    if tile_h is not None:
        th = max(1, min(int(tile_h), h_out))
        while h_out % th:
            th -= 1
        return th
    cands = _divisors_desc(h_out)

    def fits(th):
        x_blk = (th + 1) * w_out * c8 * 2          # bf16 input tile
        w_blk = 2 * c8 * cout * 2                  # bf16 weights
        y_blk = th * w_out * cout * out_bytes      # conv output tile
        return 2 * (x_blk + w_blk + y_blk) + (64 << 10) <= _VMEM_BUDGET

    valid = [th for th in cands if (th == h_out or (th * w_out) % 8 == 0) and fits(th)]
    if not valid:
        return cands[-1]
    if batch == 1:                                 # keep >= 2 grid steps for megacore sharding
        multi = [th for th in valid if h_out // th >= 2]
        if multi:
            return multi[0]
    return valid[0]


def _pick_row_tile(rows, row_bytes):
    """Row tile for the elementwise BN+LReLU kernel (multiple of 8, VMEM-budgeted)."""
    cands = [t for t in _divisors_desc(rows) if t == rows or t % 8 == 0]
    valid = [t for t in cands if 2 * t * row_bytes + (64 << 10) <= _VMEM_BUDGET]
    if not valid:
        valid = [cands[-1]]
    multi = [t for t in valid if rows // t >= 2]
    return multi[0] if multi else valid[0]


# ---------------------------------------------------------------------------
# Pallas kernel 1: conv as two K=8*Cin MXU matmuls per tile (auto-pipelined BlockSpec DMA).
# ---------------------------------------------------------------------------
def _make_conv_kernel(thw, w_out, fused):
    """x block: (1, 1, (th+1)*w_out, 8*Cin) bf16 ; w block: (2, 8*Cin, Cout) bf16.
    Train mode -> (bf16 conv tile, per-tile channel sum, per-tile centered M2).
    Fused mode -> precomputed BN scale/shift + LeakyReLU applied to the live accumulator."""
    if fused:
        def kernel(x_ref, w_ref, scale_ref, shift_ref, o_ref):
            acc = jnp.dot(x_ref[0, 0, 0:thw, :], w_ref[0],
                          preferred_element_type=jnp.float32)
            acc = acc + jnp.dot(x_ref[0, 0, w_out:w_out + thw, :], w_ref[1],
                                preferred_element_type=jnp.float32)
            z = acc * scale_ref[...] + shift_ref[...]
            o_ref[0] = jnp.where(z >= 0.0, z, 0.1 * z)
        return kernel

    def kernel(x_ref, w_ref, y_ref, sum_ref, m2_ref):
        acc = jnp.dot(x_ref[0, 0, 0:thw, :], w_ref[0],
                      preferred_element_type=jnp.float32)
        acc = acc + jnp.dot(x_ref[0, 0, w_out:w_out + thw, :], w_ref[1],
                            preferred_element_type=jnp.float32)
        y_ref[0] = acc.astype(y_ref.dtype)                       # bf16 writeback
        s = jnp.sum(acc, axis=0, keepdims=True)                  # (1, cout)
        d = acc - s * (1.0 / thw)                                # center around tile mean
        sum_ref[0, 0] = s
        m2_ref[0, 0] = jnp.sum(d * d, axis=0, keepdims=True)
    return kernel


# ---------------------------------------------------------------------------
# Pallas kernel 2 (training mode): lane-dense fused BatchNorm + LeakyReLU(0.1).
# ---------------------------------------------------------------------------
def _bn_lrelu_kernel(y_ref, scale_ref, shift_ref, o_ref):
    z = y_ref[...].astype(jnp.float32) * scale_ref[...] + shift_ref[...]
    o_ref[...] = jnp.where(z >= 0.0, z, 0.1 * z)


# ---------------------------------------------------------------------------
# Forward pass (Conv4x4.forward).
# ---------------------------------------------------------------------------
@functools.partial(jax.jit, static_argnames=("tile_h",))
def conv4x4_forward(x_nchw, w_oihw, gamma, beta,
                    running_mean=None, running_var=None, tile_h=None):
    """x_nchw: (B, Cin, H, W);  w_oihw: (Cout, Cin, 4, 4) (torch layout).
    If running_mean/var are None, batch statistics are used (training-mode torch default);
    otherwise they are used directly (eval mode, fully fused). Returns (B, Cout, H//2, W//2) f32."""
    B, cin, H, W = x_nchw.shape
    cout = w_oihw.shape[0]
    assert H % 2 == 0 and W % 2 == 0, "Conv4x4 expects even spatial dims"
    h_out, w_out = H // 2, W // 2
    c8 = 8 * cin
    eps = 1e-5

    # Input repack (bf16 throughout): pad, fold the 4 kx taps + the row parity ry into the
    # channel dim -> xcol (B, h_out+1, w_out, 8*Cin); then tile rows with the one halo row
    # per tile duplicated, flattened to a 2-D per-tile matrix.
    x = jnp.transpose(x_nchw, (0, 2, 3, 1)).astype(jnp.bfloat16)            # NHWC bf16
    xp = jnp.pad(x, ((0, 0), (1, 1), (1, 1), (0, 0)))
    hs = h_out + 1
    parts = [xp[:, ry:ry + 2 * hs - 1:2, kx:kx + 2 * w_out - 1:2, :]
             for ry in range(2) for kx in range(4)]
    xcol = jnp.concatenate(parts, axis=-1)                                   # (B, hs, w_out, 8*Cin)

    fused = running_mean is not None and running_var is not None
    th = _pick_conv_tile(h_out, w_out, c8, cout, 4 if fused else 2, B, tile_h)
    n_t = h_out // th
    thw = th * w_out

    body = xcol[:, :h_out].reshape(B, n_t, th, w_out, c8)
    halo = xcol[:, th::th][:, :, None]                                       # (B, n_t, 1, w_out, c8)
    xtile = jnp.concatenate([body, halo], axis=2).reshape(B, n_t, (th + 1) * w_out, c8)

    # Weights: OIHW -> (dy, (ry, kx, cin), cout), channel order matching xcol.
    w2 = (jnp.transpose(w_oihw, (2, 3, 1, 0)).astype(jnp.float32)
          .reshape(2, 2, 4, cin, cout).reshape(2, c8, cout).astype(jnp.bfloat16))

    x_spec = pl.BlockSpec((1, 1, (th + 1) * w_out, c8), lambda b, t: (b, t, 0, 0))
    w_spec = pl.BlockSpec((2, c8, cout), lambda b, t: (0, 0, 0))
    y_spec = pl.BlockSpec((1, thw, cout), lambda b, t: (b, t, 0))
    cparams = pltpu.CompilerParams(dimension_semantics=("parallel", "parallel"),
                                   vmem_limit_bytes=_VMEM_LIMIT)

    g = gamma.astype(jnp.float32)
    b_ = beta.astype(jnp.float32)

    if fused:
        # Eval fast path: scale/shift known up front -> BN + LeakyReLU fused into the conv epilogue.
        rstd = lax.rsqrt(running_var.astype(jnp.float32) + eps)
        scale = (g * rstd).reshape(1, cout)
        shift = (b_ - running_mean.astype(jnp.float32) * g * rstd).reshape(1, cout)
        out_nhwc = pl.pallas_call(
            _make_conv_kernel(thw, w_out, fused=True),
            out_shape=jax.ShapeDtypeStruct((B, h_out * w_out, cout), jnp.float32),
            grid=(B, n_t),
            in_specs=[x_spec, w_spec,
                      pl.BlockSpec((1, cout), lambda b, t: (0, 0)),
                      pl.BlockSpec((1, cout), lambda b, t: (0, 0))],
            out_specs=y_spec,
            compiler_params=cparams,
        )(xtile, w2, scale, shift)
        out_nhwc = out_nhwc.reshape(B, h_out, w_out, cout)
        return jnp.transpose(out_nhwc, (0, 3, 1, 2))

    # Training mode (torch default for a freshly constructed module): batch statistics.
    y_conv, sums, m2s = pl.pallas_call(
        _make_conv_kernel(thw, w_out, fused=False),
        out_shape=(jax.ShapeDtypeStruct((B, h_out * w_out, cout), jnp.bfloat16),
                   jax.ShapeDtypeStruct((B, n_t, 1, cout), jnp.float32),
                   jax.ShapeDtypeStruct((B, n_t, 1, cout), jnp.float32)),
        grid=(B, n_t),
        in_specs=[x_spec, w_spec],
        out_specs=(y_spec,
                   pl.BlockSpec((1, 1, 1, cout), lambda b, t: (b, t, 0, 0)),
                   pl.BlockSpec((1, 1, 1, cout), lambda b, t: (b, t, 0, 0))),
        compiler_params=cparams,
    )(xtile, w2)

    # Welford-style combination of the per-tile (sum, centered M2) partials.
    n = float(B * h_out * w_out)
    mean = jnp.sum(sums, axis=(0, 1, 2)) / n
    tile_mean = sums[:, :, 0, :] / float(thw)
    m2 = (jnp.sum(m2s, axis=(0, 1, 2))
          + float(thw) * jnp.sum(jnp.square(tile_mean - mean), axis=(0, 1)))
    var = m2 / n                                    # biased variance (torch normalization)
    # TODO(synk): torch's running-stat EMA update (a training-mode side effect) is not emitted;
    # it does not affect the forward output.
    rstd = lax.rsqrt(var + eps)
    scale = g * rstd
    shift = b_ - mean * scale

    # Lane-dense fused BatchNorm + LeakyReLU over the (B*h_out, w_out*cout) view.
    rows, wc = B * h_out, w_out * cout
    scale_t = jnp.tile(scale.reshape(1, cout), (1, w_out))
    shift_t = jnp.tile(shift.reshape(1, cout), (1, w_out))
    t2h = _pick_row_tile(rows, wc * 6)
    out2d = pl.pallas_call(
        _bn_lrelu_kernel,
        out_shape=jax.ShapeDtypeStruct((rows, wc), jnp.float32),
        grid=(rows // t2h,),
        in_specs=[pl.BlockSpec((t2h, wc), lambda r: (r, 0)),
                  pl.BlockSpec((1, wc), lambda r: (0, 0)),
                  pl.BlockSpec((1, wc), lambda r: (0, 0))],
        out_specs=pl.BlockSpec((t2h, wc), lambda r: (r, 0)),
        compiler_params=pltpu.CompilerParams(dimension_semantics=("parallel",),
                                             vmem_limit_bytes=_VMEM_LIMIT),
    )(y_conv.reshape(rows, wc), scale_t, shift_t)

    out_nhwc = out2d.reshape(B, h_out, w_out, cout)
    return jnp.transpose(out_nhwc, (0, 3, 1, 2))


# ---------------------------------------------------------------------------
# Pure-JAX reference (torch semantics: BatchNorm + LeakyReLU 0.1).
# ---------------------------------------------------------------------------
def _reference_forward(x_nchw, w_oihw, gamma, beta,
                       running_mean=None, running_var=None, eps=1e-5):
    y = lax.conv_general_dilated(x_nchw, w_oihw, window_strides=(2, 2),
                                 padding=((1, 1), (1, 1)),
                                 dimension_numbers=("NCHW", "OIHW", "NCHW"))
    if running_mean is None or running_var is None:
        mean = jnp.mean(y, axis=(0, 2, 3), keepdims=True)
        var = jnp.mean(jnp.square(y - mean), axis=(0, 2, 3), keepdims=True)
    else:
        mean = running_mean.reshape(1, -1, 1, 1)
        var = running_var.reshape(1, -1, 1, 1)
    z = (y - mean) * lax.rsqrt(var + eps)
    z = z * gamma.reshape(1, -1, 1, 1) + beta.reshape(1, -1, 1, 1)
    return jnp.where(z >= 0.0, z, 0.1 * z)


if __name__ == "__main__":
    root = jax.random.PRNGKey(0)
    kx, kw, kg, kb, km, kv = jax.random.split(root, 6)

    B, Cin, H, W, Cout = 2, 4, 16, 16, 32
    x = jax.random.normal(kx, (B, Cin, H, W), jnp.float32)
    w = jax.random.normal(kw, (Cout, Cin, 4, 4), jnp.float32) / jnp.sqrt(16.0 * Cin)
    gamma = 1.0 + 0.1 * jax.random.normal(kg, (Cout,), jnp.float32)
    beta = 0.1 * jax.random.normal(kb, (Cout,), jnp.float32)

    # Training-mode path (torch default). tile_h=4 -> 2 row tiles per batch element,
    # exercising the multi-tile / halo-row-duplication path and a 4-step parallel grid.
    out = conv4x4_forward(x, w, gamma, beta, tile_h=4)
    out = jax.block_until_ready(out)
    assert out.shape == (B, Cout, H // 2, W // 2), out.shape
    assert out.dtype == jnp.float32
    assert bool(jnp.all(jnp.isfinite(out)))

    # Correctness vs. pure-JAX reference on the same bf16-rounded operands.
    x_r = x.astype(jnp.bfloat16).astype(jnp.float32)
    w_r = w.astype(jnp.bfloat16).astype(jnp.float32)
    ref = _reference_forward(x_r, w_r, gamma, beta)
    assert bool(jnp.allclose(out, ref, atol=3e-2, rtol=3e-2)), \
        float(jnp.max(jnp.abs(out - ref)))

    # Eval-mode fast path (running stats given -> BN + LeakyReLU fused into the conv kernel).
    rmean = 0.05 * jax.random.normal(km, (Cout,), jnp.float32)
    rvar = 1.0 + 0.1 * jax.random.uniform(kv, (Cout,), jnp.float32)
    out_e = jax.block_until_ready(conv4x4_forward(x, w, gamma, beta, rmean, rvar))
    ref_e = _reference_forward(x_r, w_r, gamma, beta, rmean, rvar)
    assert out_e.shape == (B, Cout, H // 2, W // 2)
    assert bool(jnp.allclose(out_e, ref_e, atol=3e-2, rtol=3e-2)), \
        float(jnp.max(jnp.abs(out_e - ref_e)))

    print("KERNEL_OK")
</pallas_src>

<mosaic_0001>
module attributes {stable_mosaic.version = 11 : i64} {
  func.func @kernel(%arg0: i32, %arg1: i32, %arg2: memref<1x1x40x32xbf16, #tpu.memory_space<vmem>>, %arg3: memref<2x32x32xbf16, #tpu.memory_space<vmem>>, %arg4: memref<1x32x32xbf16, #tpu.memory_space<vmem>>, %arg5: memref<1x1x1x32xf32, #tpu.memory_space<vmem>>, %arg6: memref<1x1x1x32xf32, #tpu.memory_space<vmem>>) attributes {dimension_semantics = [#tpu.dimension_semantics<parallel>, #tpu.dimension_semantics<parallel>], iteration_bounds = array<i64: 2, 2>, scalar_prefetch = 0 : i64, scratch_operands = 0 : i64, tpu.core_type = #tpu.core_type<tc>, window_params = [{transform_indices = @transform_0, window_bounds = array<i64: 1, 1, 40, 32>}, {pipeline_mode = #tpu.pipeline_mode<synchronous>, transform_indices = @transform_1, window_bounds = array<i64: 2, 32, 32>}, {transform_indices = @transform_2, window_bounds = array<i64: 1, 32, 32>}, {transform_indices = @transform_3, window_bounds = array<i64: 1, 1, 1, 32>}, {transform_indices = @transform_4, window_bounds = array<i64: 1, 1, 1, 32>}]} {
    %c0 = arith.constant 0 : index
    %c0_0 = arith.constant 0 : index
    %c0_1 = arith.constant 0 : index
    %c0_2 = arith.constant 0 : index
    %0 = vector.load %arg2[%c0, %c0_0, %c0_1, %c0_2] : memref<1x1x40x32xbf16, #tpu.memory_space<vmem>>, vector<1x1x32x32xbf16>
    %1 = vector.shape_cast %0 : vector<1x1x32x32xbf16> to vector<32x32xbf16>
    %c0_3 = arith.constant 0 : index
    %c0_4 = arith.constant 0 : index
    %c0_5 = arith.constant 0 : index
    %2 = vector.load %arg3[%c0_3, %c0_4, %c0_5] : memref<2x32x32xbf16, #tpu.memory_space<vmem>>, vector<1x32x32xbf16>
    %3 = vector.shape_cast %2 : vector<1x32x32xbf16> to vector<32x32xbf16>
    %cst = arith.constant dense<0.000000e+00> : vector<32x32xf32>
    %4 = tpu.matmul %1, %3, %cst {dimension_numbers = #tpu.dot_dimension_numbers<[1], [0], [0], [1], [0, 0, 1, 1], [], []>} : vector<32x32xbf16>, vector<32x32xbf16>, vector<32x32xf32> -> vector<32x32xf32>
    %c0_6 = arith.constant 0 : index
    %c0_7 = arith.constant 0 : index
    %c8 = arith.constant 8 : index
    %c0_8 = arith.constant 0 : index
    %5 = vector.load %arg2[%c0_6, %c0_7, %c8, %c0_8] : memref<1x1x40x32xbf16, #tpu.memory_space<vmem>>, vector<1x1x32x32xbf16>
    %6 = vector.shape_cast %5 : vector<1x1x32x32xbf16> to vector<32x32xbf16>
    %c1 = arith.constant 1 : index
    %c0_9 = arith.constant 0 : index
    %c0_10 = arith.constant 0 : index
    %7 = vector.load %arg3[%c1, %c0_9, %c0_10] : memref<2x32x32xbf16, #tpu.memory_space<vmem>>, vector<1x32x32xbf16>
    %8 = vector.shape_cast %7 : vector<1x32x32xbf16> to vector<32x32xbf16>
    %cst_11 = arith.constant dense<0.000000e+00> : vector<32x32xf32>
    %9 = tpu.matmul %6, %8, %cst_11 {dimension_numbers = #tpu.dot_dimension_numbers<[1], [0], [0], [1], [0, 0, 1, 1], [], []>} : vector<32x32xbf16>, vector<32x32xbf16>, vector<32x32xf32> -> vector<32x32xf32>
    %10 = arith.addf %4, %9 : vector<32x32xf32>
    %11 = arith.truncf %10 : vector<32x32xf32> to vector<32x32xbf16>
    %c0_12 = arith.constant 0 : index
    %c0_13 = arith.constant 0 : index
    %c0_14 = arith.constant 0 : index
    %12 = vector.load %arg4[%c0_12, %c0_13, %c0_14] : memref<1x32x32xbf16, #tpu.memory_space<vmem>>, vector<1x32x32xbf16>
    %13 = vector.shape_cast %12 : vector<1x32x32xbf16> to vector<32x32xbf16>
    %14 = vector.shape_cast %11 : vector<32x32xbf16> to vector<1x32x32xbf16>
    tpu.vector_store %arg4[%c0_12, %c0_13, %c0_14], %14 {strides = array<i32>} : memref<1x32x32xbf16, #tpu.memory_space<vmem>>, vector<1x32x32xbf16>,
    %cst_15 = arith.constant dense<0.000000e+00> : vector<32xf32>
    %15 = vector.multi_reduction <add>, %10, %cst_15 [0] : vector<32x32xf32> to vector<32xf32>
    %16 = vector.shape_cast %15 : vector<32xf32> to vector<1x32xf32>
    %cst_16 = arith.constant 3.125000e-02 : f32
    %17 = vector.broadcast %cst_16 : f32 to vector<1x32xf32>
    %18 = arith.mulf %16, %17 : vector<1x32xf32>
    %19 = vector.broadcast %18 : vector<1x32xf32> to vector<32x32xf32>
    %20 = arith.subf %10, %19 : vector<32x32xf32>
    %c0_17 = arith.constant 0 : index
    %c0_18 = arith.constant 0 : index
    %c0_19 = arith.constant 0 : index
    %c0_20 = arith.constant 0 : index
    %21 = vector.load %arg5[%c0_17, %c0_18, %c0_19, %c0_20] : memref<1x1x1x32xf32, #tpu.memory_space<vmem>>, vector<1x1x1x32xf32>
    %22 = vector.shape_cast %21 : vector<1x1x1x32xf32> to vector<1x32xf32>
    %23 = vector.shape_cast %16 : vector<1x32xf32> to vector<1x1x1x32xf32>
    tpu.vector_store %arg5[%c0_17, %c0_18, %c0_19, %c0_20], %23 {strides = array<i32>} : memref<1x1x1x32xf32, #tpu.memory_space<vmem>>, vector<1x1x1x32xf32>,
    %24 = arith.mulf %20, %20 : vector<32x32xf32>
    %cst_21 = arith.constant dense<0.000000e+00> : vector<32xf32>
    %25 = vector.multi_reduction <add>, %24, %cst_21 [0] : vector<32x32xf32> to vector<32xf32>
    %26 = vector.shape_cast %25 : vector<32xf32> to vector<1x32xf32>
    %c0_22 = arith.constant 0 : index
    %c0_23 = arith.constant 0 : index
    %c0_24 = arith.constant 0 : index
    %c0_25 = arith.constant 0 : index
    %27 = vector.load %arg6[%c0_22, %c0_23, %c0_24, %c0_25] : memref<1x1x1x32xf32, #tpu.memory_space<vmem>>, vector<1x1x1x32xf32>
    %28 = vector.shape_cast %27 : vector<1x1x1x32xf32> to vector<1x32xf32>
    %29 = vector.shape_cast %26 : vector<1x32xf32> to vector<1x1x1x32xf32>
    tpu.vector_store %arg6[%c0_22, %c0_23, %c0_24, %c0_25], %29 {strides = array<i32>} : memref<1x1x1x32xf32, #tpu.memory_space<vmem>>, vector<1x1x1x32xf32>,
    return
  }
  func.func @transform_0(%arg0: i32, %arg1: i32) -> (i32, i32, i32, i32) {
    %c0_i32 = arith.constant 0 : i32
    %c0_i32_0 = arith.constant 0 : i32
    %c0_i32_1 = arith.constant 0 : i32
    return %arg0, %arg1, %c0_i32, %c0_i32_0 : i32, i32, i32, i32
  }
  func.func @transform_1(%arg0: i32, %arg1: i32) -> (i32, i32, i32) {
    %c0_i32 = arith.constant 0 : i32
    %c0_i32_0 = arith.constant 0 : i32
    %c0_i32_1 = arith.constant 0 : i32
    %c0_i32_2 = arith.constant 0 : i32
    return %c0_i32, %c0_i32_0, %c0_i32_1 : i32, i32, i32
  }
  func.func @transform_2(%arg0: i32, %arg1: i32) -> (i32, i32, i32) {
    %c0_i32 = arith.constant 0 : i32
    %c0_i32_0 = arith.constant 0 : i32
    return %arg0, %arg1, %c0_i32 : i32, i32, i32
  }
  func.func @transform_3(%arg0: i32, %arg1: i32) -> (i32, i32, i32, i32) {
    %c0_i32 = arith.constant 0 : i32
    %c0_i32_0 = arith.constant 0 : i32
    %c0_i32_1 = arith.constant 0 : i32
    return %arg0, %arg1, %c0_i32, %c0_i32_0 : i32, i32, i32, i32
  }
  func.func @transform_4(%arg0: i32, %arg1: i32) -> (i32, i32, i32, i32) {
    %c0_i32 = arith.constant 0 : i32
    %c0_i32_0 = arith.constant 0 : i32
    %c0_i32_1 = arith.constant 0 : i32
    return %arg0, %arg1, %c0_i32, %c0_i32_0 : i32, i32, i32, i32
  }
}

module attributes {stable_mosaic.version = 11 : i64} {
  func.func @_bn_lrelu_kernel(%arg0: i32, %arg1: memref<8x256xbf16, #tpu.memory_space<vmem>>, %arg2: memref<1x256xf32, #tpu.memory_space<vmem>>, %arg3: memref<1x256xf32, #tpu.memory_space<vmem>>, %arg4: memref<8x256xf32, #tpu.memory_space<vmem>>) attributes {dimension_semantics = [#tpu.dimension_semantics<parallel>], iteration_bounds = array<i64: 2>, scalar_prefetch = 0 : i64, scratch_operands = 0 : i64, tpu.core_type = #tpu.core_type<tc>, window_params = [{transform_indices = @transform_0, window_bounds = array<i64: 8, 256>}, {pipeline_mode = #tpu.pipeline_mode<synchronous>, transform_indices = @transform_1, window_bounds = array<i64: 1, 256>}, {pipeline_mode = #tpu.pipeline_mode<synchronous>, transform_indices = @transform_2, window_bounds = array<i64: 1, 256>}, {transform_indices = @transform_3, window_bounds = array<i64: 8, 256>}]} {
    %c0 = arith.constant 0 : index
    %c0_0 = arith.constant 0 : index
    %0 = vector.load %arg1[%c0, %c0_0] : memref<8x256xbf16, #tpu.memory_space<vmem>>, vector<8x256xbf16>
    %1 = arith.extf %0 : vector<8x256xbf16> to vector<8x256xf32>
    %c0_1 = arith.constant 0 : index
    %c0_2 = arith.constant 0 : index
    %2 = vector.load %arg2[%c0_1, %c0_2] : memref<1x256xf32, #tpu.memory_space<vmem>>, vector<1x256xf32>
    %3 = vector.broadcast %2 : vector<1x256xf32> to vector<8x256xf32>
    %4 = arith.mulf %1, %3 : vector<8x256xf32>
    %c0_3 = arith.constant 0 : index
    %c0_4 = arith.constant 0 : index
    %5 = vector.load %arg3[%c0_3, %c0_4] : memref<1x256xf32, #tpu.memory_space<vmem>>, vector<1x256xf32>
    %6 = vector.broadcast %5 : vector<1x256xf32> to vector<8x256xf32>
    %7 = arith.addf %4, %6 : vector<8x256xf32>
    %cst = arith.constant 0.000000e+00 : f32
    %8 = vector.broadcast %cst : f32 to vector<8x256xf32>
    %9 = arith.cmpf oge, %7, %8 : vector<8x256xf32>
    %cst_5 = arith.constant 1.000000e-01 : f32
    %10 = vector.broadcast %cst_5 : f32 to vector<8x256xf32>
    %11 = arith.mulf %10, %7 : vector<8x256xf32>
    %12 = arith.select %9, %7, %11 : vector<8x256xi1>, vector<8x256xf32>
    %c0_6 = arith.constant 0 : index
    %c0_7 = arith.constant 0 : index
    %13 = vector.load %arg4[%c0_6, %c0_7] : memref<8x256xf32, #tpu.memory_space<vmem>>, vector<8x256xf32>
    tpu.vector_store %arg4[%c0_6, %c0_7], %12 {strides = array<i32>} : memref<8x256xf32, #tpu.memory_space<vmem>>, vector<8x256xf32>,
    return
  }
  func.func @transform_0(%arg0: i32) -> (i32, i32) {
    %c0_i32 = arith.constant 0 : i32
    %c0_i32_0 = arith.constant 0 : i32
    return %arg0, %c0_i32 : i32, i32
  }
  func.func @transform_1(%arg0: i32) -> (i32, i32) {
    %c0_i32 = arith.constant 0 : i32
    %c0_i32_0 = arith.constant 0 : i32
    %c0_i32_1 = arith.constant 0 : i32
    return %c0_i32, %c0_i32_0 : i32, i32
  }
  func.func @transform_2(%arg0: i32) -> (i32, i32) {
    %c0_i32 = arith.constant 0 : i32
    %c0_i32_0 = arith.constant 0 : i32
    %c0_i32_1 = arith.constant 0 : i32
    return %c0_i32, %c0_i32_0 : i32, i32
  }
  func.func @transform_3(%arg0: i32) -> (i32, i32) {
    %c0_i32 = arith.constant 0 : i32
    %c0_i32_0 = arith.constant 0 : i32
    return %arg0, %c0_i32 : i32, i32
  }
}

</mosaic_0001>

<bundles_post_ra>
// kernel: conv4x4_forward.3
= control target key start
LH: loop header
LB: loop body
LE: loop exit
PB: predicated region body
PF: predicated region fallthrough
CT: control target
= control target key end

     0   :  { %s302_s12 = smov 0   ;;  %s325_s0 = inlined_call_operand.vmem [shape: bf16[16,256], index: 0, kind: input, shape index: {}]   ;;  %s326_s1 = inlined_call_operand.vmem [shape: f32[1,256], index: 1, kind: input, shape index: {}]   ;;  %s327_s2 = inlined_call_operand.vmem [shape: f32[1,256], index: 2, kind: input, shape index: {}]   ;;  %s328_s3 = inlined_call_operand.vmem [shape: f32[16,256], index: 3, kind: output, shape index: {}]  }
   0x1 LB: > { %s253_s13 = sadd.s32 4294967295, %s280_s12   ;;  %p257_p0 = scmp.ge.s32.totalorder %s280_s12, 1  ;;  %s280_s12 = sphi %s302_s12, %s13_s12  }
   0x2   : > { %p137_p1 = scmp.lt.s32.totalorder %s280_s12, 3 }
   0x4   : > { %p138_p2 = pnand %p257_p0, %p137_p1 }
   0x5   : > { %p161_p3 = scmp.lt.s32.totalorder (!%p138_p2), %s253_s13, 1 }
   0x6   : > { %141 = sbr.rel (%p138_p2) target bundleno = 26 (0x1a), region = 32 }
   0xb   : > { %s330_s13 = smov (!%p161_p3, %s253_s13), 1  ;;  %v174_v0 = vld [vmem:[%s326_s1] sm:$0x3] }
   0xc   : > { %s264_s16 = sshll.u32 %s330_s13, 3  ;;  %v182_v1 = vld [vmem:[%s327_s2] sm:$0x3]  ;;  %v176_v2 = vperm.slane %v174_v0, 0  ;;  %v177_v3 = vperm.slane %v174_v0, 1  ;;  %s265_s22 = sshll.u32 %s330_s13, 4 }
   0xd   : > { %s165_s21 = scalar_lea.vmem %s325_s0, %s264_s16  ;;  %v184_v7 = vperm.slane %v182_v1, 0  ;;  %v185_v8 = vperm.slane %v182_v1, 1  ;;  %s170_s25 = scalar_lea.vmem %s328_s3, %s265_s22 }
   0xe   : > { %v171_v4 = vld [vmem:[%s165_s21] sm:$0xff] }
   0xf   : > { %v172_v5 = vunpack.c.l.bf16 %v171_v4  ;;  %v173_v6 = vunpack.c.h.bf16 %v171_v4 }
  0x11   : > { %v180_v9 = vmul.f32 %v176_v2, %v172_v5  ;;  %v181_v10 = vmul.f32 %v177_v3, %v173_v6 }
  0x13   : > { %v188_v11 = vadd.f32 %v184_v7, %v180_v9  ;;  %v189_v12 = vadd.f32 %v185_v8, %v181_v10 }
  0x15   : > { %vm190_vm0 = vcmp.ge.f32.partialorder %v188_v11, 0.0  ;;  %v192_v13 = vmul.f32 0.1, %v188_v11  ;;  %vm191_vm1 = vcmp.ge.f32.partialorder %v189_v12, 0.0  ;;  %v193_v14 = vmul.f32 0.1, %v189_v12 }
  0x17   : > { %v194_v15 = vsel %vm190_vm0, %v188_v11, %v192_v13  ;;  %v195_v16 = vsel %vm191_vm1, %v189_v12, %v193_v14 }
  0x18   : > { %196 = vst [vmem:[%s170_s25] sm:$0xff] %v194_v15 }
  0x19   : > { %197 = vst [vmem:[%s170_s25 + $0x8] sm:$0xff] %v195_v16 }
  0x1a PF: > { %s13_s12 = sadd.s32 1, %s280_s12  }
  0x1b   : > { %p10_p4 = scmp.ge.s32.totalorder %s13_s12, 4  }
  0x1d   :  { %12 = sbr.rel (!%p10_p4) target bundleno = 1 (0x1), region = 62 }

// kernel: conv4x4_forward.2
= control target key start
LH: loop header
LB: loop body
LE: loop exit
PB: predicated region body
PF: predicated region fallthrough
CT: control target
= control target key end

     0   :  { %s773_s15 = smov 0   ;;  %s775_s16 = smov 0   ;;  %s874_s0 = inlined_call_operand.vmem [shape: bf16[2,2,40,32], index: 0, kind: input, shape index: {}]   ;;  %s875_s1 = inlined_call_operand.vmem [shape: bf16[2,32,32], index: 1, kind: input, shape index: {}]   ;;  %s876_s2 = inlined_call_operand.vmem [shape: bf16[2,64,32], index: 2, kind: output, shape index: {0}]   ;;  %s877_s3 = inlined_call_operand.vmem [shape: f32[2,2,1,32], index: 3, kind: output, shape index: {1}]   ;;  %s878_s4 = inlined_call_operand.vmem [shape: f32[2,2,1,32], index: 4, kind: output, shape index: {2}]  }
   0x1   :  { %s777_s17 = smov 0   ;;  %s779_s18 = smov 0  }
   0x2   :  { %s781_s19 = smov 0  }
   0x3 LB: > { %s24_s20 = sadd.s32 1, %s738_s17  ;;  %s27_s21 = sadd.s32 1, %s742_s18  ;;  %s746_s19 = sphi %s781_s19, %s15_s19   ;;  %s742_s18 = sphi %s779_s18, %s882_s18   ;;  %s738_s17 = sphi %s777_s17, %s881_s17   ;;  %s734_s16 = sphi %s775_s16, %s880_s16   ;;  %s730_s15 = sphi %s773_s15, %s879_s15  }
   0x4   : > { %p25_p0 = scmp.ge.s32.totalorder %s24_s20, 2  ;;  %p602_p1 = scmp.ge.s32.totalorder %s746_s19, 1 }
   0x5   : > { %p191_p2 = scmp.lt.s32.totalorder %s746_s19, 5 }
   0x6   : > { %s884_s20 = smov (%p25_p0, %s24_s20), 0  ;;  %s886_s21 = smov (!%p25_p0, %s27_s21), %s742_s18 }
   0x7   : > { %p192_p3 = pnand %p602_p1, %p191_p2  ;;  %p29_p4 = scmp.ge.s32.totalorder %s886_s21, 2 }
   0x8   : > { %p239_p5 = scmp.lt.s32.totalorder (!%p192_p3), %s734_s16, 1  ;;  %p241_p6 = scmp.lt.s32.totalorder (!%p192_p3), %s730_s15, 1 }
   0x9   : > { %s888_s21 = smov (%p29_p4, %s886_s21), 0  ;;  %195 = sbr.rel (%p192_p3) target bundleno = 207 (0xcf), region = 28 }
   0xa   : > { %s604_s14 = sshll.u32 (!%p192_p3), %s730_s15, 2 }
   0xb   : > { %p251_p7 = scmp.lt.s32.totalorder (!%p192_p3), %s604_s14, 7 }
   0xe   : > { %v636_v0 = vld [vmem:[%s875_s1 + $0x8] sm:$0xff]  ;;  %v638_v1 = vld [vmem:[%s875_s1 + $0x18] sm:$0xff]  ;;  %v635_v2 = vld [vmem:[%s875_s1] sm:$0xff]  ;;  %s890_s16 = smov (!%p239_p5, %s734_s16), 1  ;;  %vm309_vm0 = vcmask 261120   ;;  %s892_s14 = smov (!%p251_p7, %s604_s14), 7 }
   0xf   : > { %363 = vmatpush.bf16.msra.mxu1 %v636_v0  ;;  %660 = vmatpush.bf16.msra.mxu3 %v636_v0  ;;  %v637_v3 = vld [vmem:[%s875_s1 + $0x10] sm:$0xff]  ;;  %s242_s30 = scalar_select %p241_p6, %s730_s15, 1  ;;  %vm380_vm1 = vcmask 257024   ;;  %vm403_vm2 = vcmask 253952  }
  0x10   : > { %322 = vmatpush.bf16.msra.mxu0 %v638_v1  ;;  %658 = vmatpush.bf16.msra.mxu2 %v638_v1  ;;  %s667_s5 = smul.u32 10, %s890_s16  ;;  %s607_s6 = sshll.u32 %s890_s16, 1 }
  0x11   : > { %s666_s7 = smul.u32 5, %s242_s30  ;;  %s823_s8 = sadd.s32 %s607_s6, %s242_s30 }
  0x12   : > { %s605_s22 = sshll.u32 %s890_s16, 3  ;;  %s264_s28 = scalar_lea.vmem %s877_s3, %s823_s8 }
  0x13   : > { %364 = vmatpush.bf16.msra.mxu1 %v635_v2  ;;  %661 = vmatpush.bf16.msra.mxu3 %v635_v2  ;;  %s245_s9 = sadd.s32 %s667_s5, %s666_s7  ;;  %s254_s23 = sadd.s32 %s605_s22, %s892_s14 }
  0x14   : > { %323 = vmatpush.bf16.msra.mxu0 %v637_v3  ;;  %659 = vmatpush.bf16.msra.mxu2 %v637_v3  ;;  %s603_s10 = sshll.u32 %s245_s9, 2  ;;  %s606_s24 = sshll.u32 %s254_s23, 2 }
  0x15   : > { %s247_s13 = scalar_lea.vmem %s874_s0, %s603_s10  ;;  %s256_s27 = scalar_lea.vmem %s876_s2, %s606_s24 }
  0x16   : > { %v640_v4 = vld [vmem:[%s247_s13] sm:$0xff]   ;;  %v647_v5 = vld [vmem:[%s247_s13 + $0x8] sm:$0xff]   ;;  %s271_s5 = scalar_lea.vmem %s878_s4, %s823_s8 }
  0x17   : > { %v664_v6 = vld [vmem:[%s247_s13 + $0x4] sm:$0xff]   ;;  %631 = vmatmul.msk.bf16.vlgmr.msra.gmra.mxu1 %vm309_vm0, %v640_v4  ;;  %632 = vmatmul.msk.bf16.vlgmr.msra.gmra.mxu3 %vm309_vm0, %v647_v5  ;;  %v665_v7 = vld [vmem:[%s247_s13 + $0xc] sm:$0xff] }
  0x18   : > { %621 = vmatmul.msk.bf16.vlgmr.msra.gmra.mxu0 %vm309_vm0, %v664_v6  ;;  %622 = vmatmul.msk.bf16.vlgmr.msra.gmra.mxu2 %vm309_vm0, %v665_v7 }
  0x94   : > { %v366_v8 = vpop.f32.mrf.mxu1 }
  0x95   : > { %v325_v9 = vpop.f32.mrf.mxu0 }
  0x96   : > { %v367_v10 = vadd.f32 %v366_v8, %v325_v9 }
  0x98   : > { %v376_v11 = vpack.c.bf16 %v367_v10, %v367_v10  ;;  %v385_v21 = vsel %vm309_vm0, %v367_v10, 0.0 }
  0x9a   : > { %381 = vst.msk [vmem:[%s256_s27] sm:$0xf] %vm380_vm1, %v376_v11  ;;  %v371_v12 = vpop.f32.mrf.mxu3 }
  0x9b   : > { %v330_v13 = vpop.f32.mrf.mxu2 }
  0x9c   : > { %v368_v14 = vpop.f32.mrf.mxu1  ;;  %v372_v15 = vadd.f32 %v371_v12, %v330_v13 }
  0x9d   : > { %v327_v16 = vpop.f32.mrf.mxu0 }
  0x9e   : > { %v369_v17 = vadd.f32 %v368_v14, %v327_v16  ;;  %v378_v18 = vpack.c.bf16 %v372_v15, %v372_v15  ;;  %v388_v25 = vsel %vm309_vm0, %v372_v15, 0.0 }
  0xa0   : > { %v377_v19 = vpack.c.bf16 %v369_v17, %v369_v17  ;;  %v386_v20 = vsel %vm309_vm0, %v369_v17, 0.0  ;;  %383 = vst.msk [vmem:[%s256_s27 + $0x8] sm:$0xf] %vm380_vm1, %v378_v18 }
  0xa1   : > { %v387_v22 = vadd.f32 %v386_v20, %v385_v21 }
  0xa2   : > { %382 = vst.msk [vmem:[%s256_s27 + $0x4] sm:$0xf] %vm380_vm1, %v377_v19  ;;  %v373_v23 = vpop.f32.mrf.mxu3 }
  0xa3   : > { %v332_v24 = vpop.f32.mrf.mxu2  ;;  %v389_v27 = vadd.f32 %v388_v25, %v387_v22 }
  0xa4   : > { %v374_v26 = vadd.f32 %v373_v23, %v332_v24 }
  0xa6   : > { %v379_v28 = vpack.c.bf16 %v374_v26, %v374_v26  ;;  %v390_v29 = vsel %vm309_vm0, %v374_v26, 0.0 }
  0xa7   : > { %v391_v30 = vadd.f32 %v390_v29, %v389_v27 }
  0xa8   : > { %384 = vst.msk [vmem:[%s256_s27 + $0xc] sm:$0xf] %vm380_vm1, %v379_v28 }
  0xa9   : > { %v392_v31 = vrot.slane %v391_v30, 4 }
  0xab   : > { %v393_v32 = vadd.f32 %v392_v31, %v391_v30 }
  0xad   : > { %v394_v33 = vrot.slane %v393_v32, 2 }
  0xaf   : > { %v395_v34 = vadd.f32 %v394_v33, %v393_v32 }
  0xb1   : > { %v396_v35 = vrot.slane %v395_v34, 1 }
  0xb3   : > { %v397_v36 = vadd.f32 %v396_v35, %v395_v34 }
  0xb5   : > { %v398_v37 = vmul.f32 0.03125, %v397_v36  ;;  %404 = vst.msk [vmem:[%s264_s28] sm:$0x1] %vm403_vm2, %v397_v36 }
  0xb7   : > { %v399_v38 = vsub.f32 %v367_v10, %v398_v37  ;;  %v400_v39 = vsub.f32 %v369_v17, %v398_v37  ;;  %v401_v40 = vsub.f32 %v372_v15, %v398_v37  ;;  %v402_v41 = vsub.f32 %v374_v26, %v398_v37 }
  0xb9   : > { %v405_v42 = vmul.f32 %v399_v38, %v399_v38  ;;  %v406_v43 = vmul.f32 %v400_v39, %v400_v39  ;;  %v407_v44 = vmul.f32 %v401_v40, %v401_v40  ;;  %v408_v45 = vmul.f32 %v402_v41, %v402_v41 }
  0xbb   : > { %v409_v46 = vsel %vm309_vm0, %v405_v42, 0.0  ;;  %v410_v47 = vsel %vm309_vm0, %v406_v43, 0.0  ;;  %v412_v49 = vsel %vm309_vm0, %v407_v44, 0.0  ;;  %v414_v51 = vsel %vm309_vm0, %v408_v45, 0.0 }
  0xbc   : > { %v411_v48 = vadd.f32 %v410_v47, %v409_v46 }
  0xbe   : > { %v413_v50 = vadd.f32 %v412_v49, %v411_v48 }
  0xc0   : > { %v415_v52 = vadd.f32 %v414_v51, %v413_v50 }
  0xc2   : > { %v416_v53 = vrot.slane %v415_v52, 4 }
  0xc4   : > { %v417_v54 = vadd.f32 %v416_v53, %v415_v52 }
  0xc6   : > { %v418_v55 = vrot.slane %v417_v54, 2 }
  0xc8   : > { %v419_v56 = vadd.f32 %v418_v55, %v417_v54 }
  0xca   : > { %v420_v57 = vrot.slane %v419_v56, 1 }
  0xcc   : > { %v421_v58 = vadd.f32 %v420_v57, %v419_v56 }
  0xce   : > { %422 = vst.msk [vmem:[%s271_s5] sm:$0x1] %vm403_vm2, %v421_v58 }
  0xcf PF: > { %s15_s19 = sadd.s32 1, %s746_s19   ;;  %s879_s15 = smov %s738_s17 }
  0xd0   : > { %p12_p8 = scmp.ge.s32.totalorder %s15_s19, 6   ;;  %s880_s16 = smov %s742_s18 }
  0xd1   : > { %s881_s17 = smov %s884_s20  ;;  %s882_s18 = smov %s888_s21 }
  0xd2   :  { %14 = sbr.rel (!%p12_p8) target bundleno = 3 (0x3), region = 83 }

</bundles_post_ra>
